<compile_context>
chip_gen: v7x
topology: tpu7x:2x2x1
jax: 0.10.0
libtpu: 0.0.40
codegen_flags: <defaults>
</compile_context>

<pallas_src>
import functools

import jax
import jax.numpy as jnp
from jax.experimental import pallas as pl
from jax.experimental.pallas import tpu as pltpu


def _sharp_kernel(w_ref, x_ref, o_ref, *, W):
    # x_ref / o_ref: (TILE_NC, H*W) lane-dense tiles of image planes.
    # w_ref:         (1, H*W) per-pixel blend weight, broadcast over planes.
    x = x_ref[...].astype(jnp.float32)
    w = w_ref[...]

    # Separable 3x3 box sum along the flattened H*W lane axis.
    # Row-wrap / plane-wrap contamination from the rolls only ever lands on
    # border rows/cols, where w == 0, so it never reaches the output.
    row = x + jnp.roll(x, 1, axis=1) + jnp.roll(x, -1, axis=1)
    box = row + jnp.roll(row, W, axis=1) + jnp.roll(row, -W, axis=1)

    # interior: ratio*x + (1-ratio)*(box+4x)/13 == x + ((1-ratio)/13)*(box-9x)
    # border:   degenerate == x and w == 0 -> exactly x before the clamp.
    out = x + w * (box - 9.0 * x)
    o_ref[...] = jnp.clip(out, 0.0, 1.0).astype(o_ref.dtype)


def adjust_sharpness_pallas(x, ratio=3.0):
    """x: float NCHW image tensor with values in [0, 1]."""
    N, C, H, W = x.shape
    if H <= 2 or W <= 2:
        # torchvision early-returns the input unchanged for tiny images
        return x

    NC, HW = N * C, H * W
    x_flat = x.reshape(NC, HW)  # free view (contiguous dims); lane axis = H*W

    # Precomputed per-pixel blend weight row (computed once in the wrapper,
    # never recomputed per grid step inside the kernel).
    idx = jnp.arange(HW, dtype=jnp.int32)
    ri, ci = idx // W, idx % W
    interior = (ri >= 1) & (ri <= H - 2) & (ci >= 1) & (ci <= W - 2)
    w2 = jnp.where(interior, (1.0 - float(ratio)) / 13.0, 0.0)
    w2 = w2.astype(jnp.float32)[None, :]  # (1, H*W)

    # Tile planes per grid step so each input block is ~1 MiB.  Second-minor
    # block dim must be a multiple of 8 (sublane) unless it covers the full
    # NC extent.
    plane_bytes = HW * x.dtype.itemsize
    tile_nc = max(1, (1 << 20) // plane_bytes)
    if tile_nc >= NC:
        tile_nc = NC
    else:
        tile_nc = min(NC, max(8, (tile_nc // 8) * 8))
    # TODO(synk): for very large single planes (H*W*itemsize >> 1 MiB) also
    # tile H with a 1-row halo instead of relying on a small tile_nc.

    # Double-buffered in + out blocks plus the resident weight row; keep the
    # explicit scoped-VMEM request well under v7x's 64 MiB physical VMEM.
    vmem_needed = 4 * tile_nc * plane_bytes + 4 * HW * 4 + (1 << 20)
    vmem_limit = int(min(56 << 20, max(32 << 20, vmem_needed)))

    grid = (pl.cdiv(NC, tile_nc),)
    kernel = functools.partial(_sharp_kernel, W=W)

    out = pl.pallas_call(
        kernel,
        out_shape=jax.ShapeDtypeStruct((NC, HW), x.dtype),
        grid_spec=pltpu.PrefetchScalarGridSpec(
            num_scalar_prefetch=0,
            grid=grid,
            in_specs=[
                pl.BlockSpec((1, HW), lambda i: (0, 0)),        # weights (resident)
                pl.BlockSpec((tile_nc, HW), lambda i: (i, 0)),  # image planes
            ],
            out_specs=pl.BlockSpec((tile_nc, HW), lambda i: (i, 0)),
        ),
        compiler_params=pltpu.CompilerParams(
            dimension_semantics=("parallel",),
            vmem_limit_bytes=vmem_limit,
        ),
    )(w2, x_flat)
    return out.reshape(N, C, H, W)


def sharp_forward(noised_and_cover, ratio=3.0):
    """Mirror of Sharp.forward: replaces element 0 of the list."""
    out = list(noised_and_cover)
    out[0] = adjust_sharpness_pallas(out[0], ratio=ratio)
    return out


def _ref_adjust_sharpness(x, ratio=3.0):
    """Pure-JAX reference (mirrors torchvision's tensor implementation)."""
    N, C, H, W = x.shape
    k = jnp.ones((3, 3), jnp.float32).at[1, 1].set(5.0)
    k = k / k.sum()
    kern = jnp.broadcast_to(k, (C, 1, 3, 3))
    blurred = jax.lax.conv_general_dilated(
        x.astype(jnp.float32), kern, window_strides=(1, 1), padding="VALID",
        dimension_numbers=("NCHW", "OIHW", "NCHW"), feature_group_count=C)
    degenerate = x.astype(jnp.float32).at[:, :, 1:-1, 1:-1].set(blurred)
    out = jnp.clip(ratio * x + (1.0 - ratio) * degenerate, 0.0, 1.0)
    return out.astype(x.dtype)


if __name__ == "__main__":
    key = jax.random.PRNGKey(0)
    k0, k1 = jax.random.split(key)
    # small NCHW images in [0, 1], like the watermarking pipeline's noised/cover pair
    noised = jax.random.uniform(k0, (2, 4, 16, 16), dtype=jnp.float32)
    cover = jax.random.uniform(k1, (2, 4, 16, 16), dtype=jnp.float32)

    result = sharp_forward([noised, cover], ratio=3.0)
    out = jax.block_until_ready(result[0])

    ref = jax.block_until_ready(_ref_adjust_sharpness(noised, ratio=3.0))
    assert out.shape == noised.shape and out.dtype == noised.dtype
    assert jnp.allclose(out, ref, atol=1e-5, rtol=1e-5), "mismatch vs reference"
    # cover image passes through untouched
    assert jnp.array_equal(result[1], cover)

    print("KERNEL_OK")
</pallas_src>

<mosaic_0001>
module attributes {stable_mosaic.version = 11 : i64} {
  func.func @_sharp_kernel(%arg0: i32, %arg1: memref<1x256xf32, #tpu.memory_space<vmem>>, %arg2: memref<8x256xf32, #tpu.memory_space<vmem>>, %arg3: memref<8x256xf32, #tpu.memory_space<vmem>>) attributes {dimension_semantics = [#tpu.dimension_semantics<parallel>], iteration_bounds = array<i64: 1>, scalar_prefetch = 0 : i64, scratch_operands = 0 : i64, tpu.core_type = #tpu.core_type<tc>, window_params = [{pipeline_mode = #tpu.pipeline_mode<synchronous>, transform_indices = @transform_0, window_bounds = array<i64: 1, 256>}, {transform_indices = @transform_1, window_bounds = array<i64: 8, 256>}, {transform_indices = @transform_2, window_bounds = array<i64: 8, 256>}]} {
    %c0 = arith.constant 0 : index
    %c0_0 = arith.constant 0 : index
    %0 = vector.load %arg2[%c0, %c0_0] : memref<8x256xf32, #tpu.memory_space<vmem>>, vector<8x256xf32>
    %c0_1 = arith.constant 0 : index
    %c0_2 = arith.constant 0 : index
    %1 = vector.load %arg1[%c0_1, %c0_2] : memref<1x256xf32, #tpu.memory_space<vmem>>, vector<1x256xf32>
    %2 = vector.extract_strided_slice %0 {offsets = [0, 255], sizes = [8, 1], strides = [1, 1]} : vector<8x256xf32> to vector<8x1xf32>
    %3 = vector.extract_strided_slice %0 {offsets = [0, 0], sizes = [8, 255], strides = [1, 1]} : vector<8x256xf32> to vector<8x255xf32>
    %4 = tpu.concatenate %2, %3 in 1 : vector<8x1xf32>, vector<8x255xf32> -> vector<8x256xf32>
    %5 = arith.addf %0, %4 : vector<8x256xf32>
    %6 = vector.extract_strided_slice %0 {offsets = [0, 1], sizes = [8, 255], strides = [1, 1]} : vector<8x256xf32> to vector<8x255xf32>
    %7 = vector.extract_strided_slice %0 {offsets = [0, 0], sizes = [8, 1], strides = [1, 1]} : vector<8x256xf32> to vector<8x1xf32>
    %8 = tpu.concatenate %6, %7 in 1 : vector<8x255xf32>, vector<8x1xf32> -> vector<8x256xf32>
    %9 = arith.addf %5, %8 : vector<8x256xf32>
    %10 = vector.extract_strided_slice %9 {offsets = [0, 240], sizes = [8, 16], strides = [1, 1]} : vector<8x256xf32> to vector<8x16xf32>
    %11 = vector.extract_strided_slice %9 {offsets = [0, 0], sizes = [8, 240], strides = [1, 1]} : vector<8x256xf32> to vector<8x240xf32>
    %12 = tpu.concatenate %10, %11 in 1 : vector<8x16xf32>, vector<8x240xf32> -> vector<8x256xf32>
    %13 = arith.addf %9, %12 : vector<8x256xf32>
    %14 = vector.extract_strided_slice %9 {offsets = [0, 16], sizes = [8, 240], strides = [1, 1]} : vector<8x256xf32> to vector<8x240xf32>
    %15 = vector.extract_strided_slice %9 {offsets = [0, 0], sizes = [8, 16], strides = [1, 1]} : vector<8x256xf32> to vector<8x16xf32>
    %16 = tpu.concatenate %14, %15 in 1 : vector<8x240xf32>, vector<8x16xf32> -> vector<8x256xf32>
    %17 = arith.addf %13, %16 : vector<8x256xf32>
    %cst = arith.constant 9.000000e+00 : f32
    %18 = vector.broadcast %cst : f32 to vector<8x256xf32>
    %19 = arith.mulf %18, %0 : vector<8x256xf32>
    %20 = arith.subf %17, %19 : vector<8x256xf32>
    %21 = vector.broadcast %1 : vector<1x256xf32> to vector<8x256xf32>
    %22 = arith.mulf %21, %20 : vector<8x256xf32>
    %23 = arith.addf %0, %22 : vector<8x256xf32>
    %cst_3 = arith.constant 0.000000e+00 : f32
    %cst_4 = arith.constant 1.000000e+00 : f32
    %24 = vector.broadcast %cst_3 : f32 to vector<8x256xf32>
    %25 = arith.maximumf %24, %23 : vector<8x256xf32>
    %26 = vector.broadcast %cst_4 : f32 to vector<8x256xf32>
    %27 = arith.minimumf %26, %25 : vector<8x256xf32>
    %c0_5 = arith.constant 0 : index
    %c0_6 = arith.constant 0 : index
    %28 = vector.load %arg3[%c0_5, %c0_6] : memref<8x256xf32, #tpu.memory_space<vmem>>, vector<8x256xf32>
    tpu.vector_store %arg3[%c0_5, %c0_6], %27 {strides = array<i32>} : memref<8x256xf32, #tpu.memory_space<vmem>>, vector<8x256xf32>,
    return
  }
  func.func @transform_0(%arg0: i32) -> (i32, i32) {
    %c0_i32 = arith.constant 0 : i32
    %c0_i32_0 = arith.constant 0 : i32
    %c0_i32_1 = arith.constant 0 : i32
    return %c0_i32, %c0_i32_0 : i32, i32
  }
  func.func @transform_1(%arg0: i32) -> (i32, i32) {
    %c0_i32 = arith.constant 0 : i32
    %c0_i32_0 = arith.constant 0 : i32
    return %arg0, %c0_i32 : i32, i32
  }
  func.func @transform_2(%arg0: i32) -> (i32, i32) {
    %c0_i32 = arith.constant 0 : i32
    %c0_i32_0 = arith.constant 0 : i32
    return %arg0, %c0_i32 : i32, i32
  }
}

</mosaic_0001>

<bundles_post_ra>
// kernel: tpu_custom_call.1
= control target key start
LH: loop header
LB: loop body
LE: loop exit
PB: predicated region body
PF: predicated region fallthrough
CT: control target
= control target key end

     0   :  { %7 = vsyncpa [#allocation3], 0  ;;  %s269_s0 = inlined_call_operand.hbm [shape: f32[1,256], index: 0, kind: input, shape index: {}]   ;;  %s270_s1 = inlined_call_operand.hbm [shape: f32[8,256], index: 1, kind: input, shape index: {}]   ;;  %s271_s2 = inlined_call_operand.hbm [shape: f32[8,256], index: 2, kind: output, shape index: {}]  }
   0x1   :  { %8 = vsyncpa [#allocation6], 0 }
   0x2   :  { %9 = vsyncpa [#allocation4], 0  ;;  %s211_s9 = smov [#allocation2]   ;;  %s212_s11 = smov [#allocation5]  }
   0x3   :  { %s16_s10 = sshll.u32 %s211_s9, 4  ;;  %s26_s12 = sshll.u32 %s212_s11, 4  ;;  %s17_s10 = int_to_ptr.vmem [resolvable:$true] %s16_s10  ;;  %s27_s12 = int_to_ptr.vmem [resolvable:$true] %s26_s12 }
   0x4   :  { %s139_s15 = scalar_lea.hbm %s269_s0, 32 }
   0x5   :  { %p140_p0 = scmp.ne.s32.totalorder %s269_s0, %s139_s15  ;;  %p143_p1 = scmp.lt.u32.totalorder %s139_s15, %s269_s0 }
   0x7   :  { %p145_p2 = pnand %p143_p1, %p140_p0 }
   0x9   :  { %148 = shalt.err (!%p145_p2)
}
   0xa   :  { %s149_s20 = scalar_lea.vmem %s17_s10, 32  ;;  %p154_p4 = scmp.lt.s32.totalorder %s17_s10, %s17_s10 }
   0xb   :  { %p150_p3 = scmp.ne.s32.totalorder %s17_s10, %s149_s20  ;;  %p155_p5 = scmp.lt.s32.totalorder %s149_s20, %s149_s20 }
   0xd   :  { %p156_p6 = por %p155_p5, %p154_p4 }
   0xf   :  { %p157_p7 = pnand %p156_p6, %p150_p3 }
  0x11   :  { %160 = shalt.err (!%p157_p7)
}
  0x12   :  { %19 = dma.hbm_to_vmem [thread:$0]  %s269_s0, 32, %s17_s10, [#allocation3]  }
  0x13   :  { %s161_s25 = scalar_lea.hbm %s270_s1, 256 }
  0x14   :  { %p162_p8 = scmp.ne.s32.totalorder %s270_s1, %s161_s25  ;;  %p165_p9 = scmp.lt.u32.totalorder %s161_s25, %s270_s1 }
  0x16   :  { %p167_p10 = pnand %p165_p9, %p162_p8 }
  0x18   :  { %170 = shalt.err (!%p167_p10)
}
  0x19   :  { %s171_s30 = scalar_lea.vmem %s27_s12, 256  ;;  %p176_p12 = scmp.lt.s32.totalorder %s27_s12, %s27_s12 }
  0x1a   :  { %p172_p11 = scmp.ne.s32.totalorder %s27_s12, %s171_s30  ;;  %p177_p13 = scmp.lt.s32.totalorder %s171_s30, %s171_s30 }
  0x1c   :  { %p178_p0 = por %p177_p13, %p176_p12 }
  0x1e   :  { %p179_p1 = pnand %p178_p0, %p172_p11 }
  0x20   :  { %182 = shalt.err (!%p179_p1)
}
  0x21   :  { %29 = dma.hbm_to_vmem [thread:$0]  %s270_s1, 256, %s27_s12, [#allocation6]  }
  0x22   :  { %205 = dma.done.wait [#allocation3], 32  }
  0x23   :  { %206 = vsyncadd [#allocation3], 4294967264 }
  0x24   :  { %207 = dma.done.wait [#allocation6], 256  }
  0x25   :  { %208 = vsyncadd [#allocation6], 4294967040  ;;  %v37_v0 = vld [vmem:[#allocation5 + $0x8] sm:$0xff]  ;;  %v36_v1 = vld [vmem:[#allocation5] sm:$0xff]  ;;  %s213_s4 = smov 1   ;;  %s214_s5 = smov 127   ;;  %v96_v14 = vlaneseq }
  0x26   :  { %40 = vrot.lane.b32.xlu0 %v37_v0, %s213_s4  ;;  %53 = vrot.lane.b32.xlu1 %v36_v1, %s214_s5  ;;  %vm46_vm0 = vcmask 7168   ;;  %vm57_vm1 = vcmask 1039360   ;;  %s215_s1 = smov 16   ;;  %s216_s6 = smov 112   ;;  %vm72_vm2 = vcmask 130048   ;;  %vm83_vm3 = vcmask 916480  }
  0x27   :  { %v97_v15 = vshrl.u32 %v96_v14, 7  ;;  %v38_v22 = vld [vmem:[#allocation2] sm:$0x3]  ;;  %v92_v26 = vmul.f32 9.0, %v37_v0  ;;  %v91_v28 = vmul.f32 9.0, %v36_v1  ;;  %s217_s7 = smov [#allocation7]  }
  0x28   :  { %s122_s8 = sshll.u32 %s217_s7, 4  ;;  %s123_s8 = int_to_ptr.vmem [resolvable:$true] %s122_s8 }
  0x29   :  { %v98_v20 = vsub.s32 0, %v97_v15  ;;  %v102_v21 = vsub.s32 1, %v97_v15  ;;  %s183_s9 = scalar_lea.vmem %s123_s8, 256  ;;  %p188_p3 = scmp.lt.s32.totalorder %s123_s8, %s123_s8 }
  0x2a   :  { %55 = vrot.lane.b32.xlu1 %v37_v0, %s214_s5  ;;  %44 = vrot.lane.b32.xlu0 %v36_v1, %s213_s4  ;;  %p184_p2 = scmp.ne.s32.totalorder %s123_s8, %s183_s9  ;;  %p189_p4 = scmp.lt.s32.totalorder %s183_s9, %s183_s9 }
  0x2b   :  { %v99_v31 = vrot.slane %v38_v22, %v98_v20  ;;  %v103_v32 = vrot.slane %v38_v22, %v102_v21 }
  0x2c   :  { %p190_p5 = por %p189_p4, %p188_p3 }
  0x2e   :  { %p191_p6 = pnand %p190_p5, %p184_p2 }
  0x98   :  { %v41_v2 = vpop.permute.xlu0 %40  ;;  %v54_v3 = vpop.permute.xlu1 %53 }
  0x9c   :  { %v56_v4 = vpop.permute.xlu1 %55  ;;  %v45_v5 = vpop.permute.xlu0 %44 }
  0x9d   :  { %v47_v6 = vsel %vm46_vm0, %v45_v5, %v41_v2  ;;  %v50_v7 = vsel %vm46_vm0, %v41_v2, %v45_v5  ;;  %v58_v10 = vsel %vm57_vm1, %v54_v3, %v56_v4  ;;  %v62_v11 = vsel %vm57_vm1, %v56_v4, %v54_v3 }
  0x9e   :  { %v51_v8 = vadd.f32 %v50_v7, %v36_v1  ;;  %v52_v9 = vadd.f32 %v47_v6, %v37_v0 }
  0xa0   :  { %v63_v12 = vadd.f32 %v58_v10, %v51_v8  ;;  %v64_v13 = vadd.f32 %v62_v11, %v52_v9 }
  0xa2   :  { %70 = vrot.lane.b32.xlu1 %v63_v12, %s215_s1  ;;  %66 = vrot.lane.b32.xlu0 %v64_v13, %s215_s1 }
  0xa6   :  { %81 = vrot.lane.b32.xlu1 %v64_v13, %s216_s6  ;;  %79 = vrot.lane.b32.xlu0 %v63_v12, %s216_s6 }
 0x114   :  { %v71_v16 = vpop.permute.xlu1 %70  ;;  %v67_v17 = vpop.permute.xlu0 %66 }
 0x115   :  { %v73_v18 = vsel %vm72_vm2, %v71_v16, %v67_v17  ;;  %v76_v19 = vsel %vm72_vm2, %v67_v17, %v71_v16 }
 0x116   :  { %v77_v23 = vadd.f32 %v76_v19, %v63_v12  ;;  %v78_v24 = vadd.f32 %v73_v18, %v64_v13 }
 0x118   :  { %v82_v25 = vpop.permute.xlu1 %81  ;;  %v80_v27 = vpop.permute.xlu0 %79 }
 0x119   :  { %v84_v29 = vsel %vm83_vm3, %v80_v27, %v82_v25  ;;  %v88_v30 = vsel %vm83_vm3, %v82_v25, %v80_v27 }
 0x11a   :  { %v89_v33 = vadd.f32 %v84_v29, %v77_v23  ;;  %v90_v34 = vadd.f32 %v88_v30, %v78_v24 }
 0x11c   :  { %v93_v35 = vsub.f32 %v89_v33, %v91_v28  ;;  %v94_v36 = vsub.f32 %v90_v34, %v92_v26 }
 0x11e   :  { %v106_v37 = vmul.f32 %v99_v31, %v93_v35  ;;  %v107_v38 = vmul.f32 %v103_v32, %v94_v36 }
 0x120   :  { %v108_v39 = vadd.f32 %v106_v37, %v36_v1  ;;  %v109_v40 = vadd.f32 %v107_v38, %v37_v0 }
 0x122   :  { %v110_v41 = vmax.f32 %v108_v39, 0.0  ;;  %v111_v42 = vmax.f32 %v109_v40, 0.0 }
 0x124   :  { %v112_v43 = vmin.f32 %v110_v41, 1.0  ;;  %v113_v44 = vmin.f32 %v111_v42, 1.0 }
 0x126   :  { %114 = vst [vmem:[#allocation7] sm:$0xff] %v112_v43  ;;  %115 = vst [vmem:[#allocation7 + $0x8] sm:$0xff] %v113_v44 }
 0x127   :  { %194 = shalt.err (!%p191_p6)
}
 0x128   :  { %s195_s12 = scalar_lea.hbm %s271_s2, 256 }
 0x129   :  { %p196_p7 = scmp.ne.s32.totalorder %s271_s2, %s195_s12  ;;  %p199_p8 = scmp.lt.u32.totalorder %s195_s12, %s271_s2 }
 0x12b   :  { %p201_p9 = pnand %p199_p8, %p196_p7 }
 0x12d   :  { %204 = shalt.err (!%p201_p9)
}
 0x12e   :  { %125 = dma.vmem_to_hbm [thread:$0]  %s123_s8, 256, %s271_s2, [#allocation4]  }
 0x12f   :  { %209 = dma.done.wait [#allocation4], 256  }
 0x130   :  { %210 = vsyncadd [#allocation4], 4294967040 }
 0x131   :  { %129 = vsyncpa [#allocation3], 1 }
 0x132   :  { %130 = vsyncpa [#allocation6], 1 }
 0x133   :  { %131 = vsyncpa [#allocation4], 1 }

</bundles_post_ra>
